<compile_context>
chip_gen: v6e
topology: v6e:2x2x1
jax: 0.10.0
libtpu: 0.0.40
codegen_flags: <defaults>
</compile_context>

<pallas_src>
import jax
import jax.numpy as jnp
from jax.experimental import pallas as pl
from jax.experimental.pallas import tpu as pltpu


def _pick_lane_tile(hw, c, dtype_bytes, n_batch, *, target_block_bytes=2 << 20):
    """Lane tile: multiple of 128, sized so one x block is ~target_block_bytes."""
    hw_pad = int(pl.cdiv(hw, 128)) * 128
    budget = max(128, ((target_block_bytes // max(1, c * dtype_bytes)) // 128) * 128)
    tw = min(budget, hw_pad)
    # Keep at least ~4 grid steps when possible so the ("parallel","parallel")
    # grid can shard across both v7x TensorCores and keep the pipeline busy.
    while tw > 256 and n_batch * int(pl.cdiv(hw, tw)) < 4:
        tw = max(128, ((tw // 2) // 128) * 128)
    return tw


def _make_additive_noise_kernel(reps, nc, scale, shift):
    """reps = C // noise_channels; scale = std * weight; shift = mean * weight."""

    def kernel(x_ref, noise_ref, o_ref):
        # x_ref:     (C,  TILE)   activations (channels on sublanes, H*W on lanes)
        # noise_ref: (NC, TILE)   per-batch noise slab
        # o_ref:     (C,  TILE)
        n = noise_ref[...].astype(jnp.float32)
        if scale != 1.0:
            n = n * scale
        if shift != 0.0:
            n = n + shift
        if nc == 1 or reps == 1:
            # nc == 1: (C,T) + (1,T) uses the cheap sublane-broadcast add path.
            # reps == 1: shapes already match.  No materialized noise copy.
            o_ref[...] = (x_ref[...].astype(jnp.float32) + n).astype(o_ref.dtype)
        else:
            # Blocked channel repeat: static per-rep Ref-view slices instead of
            # jnp.tile (avoids materializing a (C, TILE) noise copy in vregs).
            for r in range(reps):
                sl = pl.ds(r * nc, nc)
                o_ref[sl, :] = (x_ref[sl, :].astype(jnp.float32) + n).astype(o_ref.dtype)

    return kernel


def _sample_noise(key, shape, dtype):
    # Shared by forward + reference so both see identical draws.
    return jax.random.normal(key, shape, dtype)


def additive_noise_forward(x_nchw, key, *, noise_channels=1, mean=0.0, std=1.0,
                           weighted=False):
    """x_nchw: (N, C, H, W).  Returns x + noise.repeat(...) * weight (eval-style)."""
    assert not weighted  # TODO(synk): learned per-channel weight not implemented
    n, c, h, w = x_nchw.shape
    assert c % noise_channels == 0
    reps = c // noise_channels
    hw = h * w
    dtype_bytes = jnp.dtype(x_nchw.dtype).itemsize

    x_flat = x_nchw.reshape(n, c, hw)                       # free reshape, no transpose
    noise = _sample_noise(key, (n, noise_channels, hw), x_nchw.dtype)

    tw = _pick_lane_tile(hw, c, dtype_bytes, n)
    grid = (n, int(pl.cdiv(hw, tw)))                        # ragged tail block is masked

    weight = 1.0                                            # weighted=False
    kernel = _make_additive_noise_kernel(
        reps, noise_channels, float(std) * weight, float(mean) * weight)

    # Double-buffered x + out + noise footprint, with headroom; explicit limit
    # keeps the kernel portable across v5e (16 MiB default scoped limit),
    # v6e (32 MiB) and v7x (32 MiB default / 64 MiB physical).
    block_bytes = (2 * c + noise_channels) * tw * dtype_bytes
    vmem_limit = int(min(48 << 20, max(16 << 20, 4 * block_bytes)))

    out_flat = pl.pallas_call(
        kernel,
        out_shape=jax.ShapeDtypeStruct((n, c, hw), x_nchw.dtype),
        grid_spec=pltpu.PrefetchScalarGridSpec(
            num_scalar_prefetch=0,
            grid=grid,
            in_specs=[
                pl.BlockSpec((pl.Squeezed(), c, tw), lambda i, j: (i, 0, j)),
                pl.BlockSpec((pl.Squeezed(), noise_channels, tw), lambda i, j: (i, 0, j)),
            ],
            out_specs=pl.BlockSpec((pl.Squeezed(), c, tw), lambda i, j: (i, 0, j)),
        ),
        compiler_params=pltpu.CompilerParams(
            dimension_semantics=("parallel", "parallel"),
            vmem_limit_bytes=vmem_limit),
    )(x_flat, noise)

    return out_flat.reshape(n, c, h, w)


def additive_noise_reference(x_nchw, key, *, noise_channels=1, mean=0.0, std=1.0):
    """Pure-JAX reference mirroring the PyTorch forward exactly."""
    n, c, h, w = x_nchw.shape
    noise = _sample_noise(key, (n, noise_channels, h * w), x_nchw.dtype) * std + mean
    noise = noise.reshape(n, noise_channels, h, w)
    return x_nchw + jnp.tile(noise, (1, c // noise_channels, 1, 1)) * 1.0


if __name__ == "__main__":
    key = jax.random.PRNGKey(0)
    k_x, k_n1, k_n2, k_x3, k_n3 = jax.random.split(key, 5)

    N, C, H, W = 2, 4, 16, 16
    x = jax.random.normal(k_x, (N, C, H, W), jnp.float32)

    # Default config: noise_channels=1, mean=0.0, std=1.0, weighted=False.
    out = jax.block_until_ready(additive_noise_forward(x, k_n1))
    ref = jax.block_until_ready(additive_noise_reference(x, k_n1))
    assert out.shape == x.shape, out.shape
    assert jnp.allclose(out, ref, atol=1e-6, rtol=1e-6), \
        float(jnp.max(jnp.abs(out - ref)))
    # Structural check: with noise_channels=1 the same noise plane is added
    # to every channel (the .repeat(reps) semantics).
    d = out - x
    assert jnp.allclose(d, d[:, :1], atol=1e-5), "noise not shared across channels"

    # Non-default config: exercises std/mean scaling and the channel-repeat path.
    out2 = jax.block_until_ready(
        additive_noise_forward(x, k_n2, noise_channels=2, mean=0.5, std=2.0))
    ref2 = jax.block_until_ready(
        additive_noise_reference(x, k_n2, noise_channels=2, mean=0.5, std=2.0))
    assert jnp.allclose(out2, ref2, atol=1e-6, rtol=1e-6), \
        float(jnp.max(jnp.abs(out2 - ref2)))

    # Non-128-divisible spatial size: exercises the masked ragged last block.
    x3 = jax.random.normal(k_x3, (2, 4, 10, 10), jnp.float32)
    out3 = jax.block_until_ready(additive_noise_forward(x3, k_n3))
    ref3 = jax.block_until_ready(additive_noise_reference(x3, k_n3))
    assert jnp.allclose(out3, ref3, atol=1e-6, rtol=1e-6), \
        float(jnp.max(jnp.abs(out3 - ref3)))

    print("KERNEL_OK")
</pallas_src>

<mosaic_0001>
module attributes {stable_mosaic.version = 11 : i64} {
  func.func @kernel(%arg0: i32, %arg1: i32, %arg2: memref<1x4x256xf32, #tpu.memory_space<vmem>>, %arg3: memref<1x1x256xf32, #tpu.memory_space<vmem>>, %arg4: memref<1x4x256xf32, #tpu.memory_space<vmem>>) attributes {dimension_semantics = [#tpu.dimension_semantics<parallel>, #tpu.dimension_semantics<parallel>], iteration_bounds = array<i64: 2, 1>, scalar_prefetch = 0 : i64, scratch_operands = 0 : i64, tpu.core_type = #tpu.core_type<tc>, window_params = [{transform_indices = @transform_0, window_bounds = array<i64: 1, 4, 256>}, {transform_indices = @transform_1, window_bounds = array<i64: 1, 1, 256>}, {transform_indices = @transform_2, window_bounds = array<i64: 1, 4, 256>}]} {
    %c0 = arith.constant 0 : index
    %c0_0 = arith.constant 0 : index
    %c0_1 = arith.constant 0 : index
    %0 = vector.load %arg3[%c0, %c0_0, %c0_1] : memref<1x1x256xf32, #tpu.memory_space<vmem>>, vector<1x1x256xf32>
    %1 = vector.shape_cast %0 : vector<1x1x256xf32> to vector<1x256xf32>
    %c0_2 = arith.constant 0 : index
    %c0_3 = arith.constant 0 : index
    %c0_4 = arith.constant 0 : index
    %2 = vector.load %arg2[%c0_2, %c0_3, %c0_4] : memref<1x4x256xf32, #tpu.memory_space<vmem>>, vector<1x4x256xf32>
    %3 = vector.shape_cast %2 : vector<1x4x256xf32> to vector<4x256xf32>
    %4 = vector.broadcast %1 : vector<1x256xf32> to vector<4x256xf32>
    %5 = arith.addf %3, %4 : vector<4x256xf32>
    %c0_5 = arith.constant 0 : index
    %c0_6 = arith.constant 0 : index
    %c0_7 = arith.constant 0 : index
    %6 = vector.load %arg4[%c0_5, %c0_6, %c0_7] : memref<1x4x256xf32, #tpu.memory_space<vmem>>, vector<1x4x256xf32>
    %7 = vector.shape_cast %6 : vector<1x4x256xf32> to vector<4x256xf32>
    %8 = vector.shape_cast %5 : vector<4x256xf32> to vector<1x4x256xf32>
    tpu.vector_store %arg4[%c0_5, %c0_6, %c0_7], %8 {strides = array<i32>} : memref<1x4x256xf32, #tpu.memory_space<vmem>>, vector<1x4x256xf32>,
    return
  }
  func.func @transform_0(%arg0: i32, %arg1: i32) -> (i32, i32, i32) {
    %c0_i32 = arith.constant 0 : i32
    %c0_i32_0 = arith.constant 0 : i32
    return %arg0, %c0_i32, %arg1 : i32, i32, i32
  }
  func.func @transform_1(%arg0: i32, %arg1: i32) -> (i32, i32, i32) {
    %c0_i32 = arith.constant 0 : i32
    %c0_i32_0 = arith.constant 0 : i32
    return %arg0, %c0_i32, %arg1 : i32, i32, i32
  }
  func.func @transform_2(%arg0: i32, %arg1: i32) -> (i32, i32, i32) {
    %c0_i32 = arith.constant 0 : i32
    %c0_i32_0 = arith.constant 0 : i32
    return %arg0, %c0_i32, %arg1 : i32, i32, i32
  }
}

</mosaic_0001>

<bundles_post_ra>
// kernel: tpu_custom_call.1
= control target key start
LH: loop header
LB: loop body
LE: loop exit
PB: predicated region body
PF: predicated region fallthrough
CT: control target
= control target key end

     0   :  { %7 = vsyncpa [#allocation3], 0  ;;  %s778_s0 = inlined_call_operand.hbm [shape: f32[2,4,256], index: 0, kind: input, shape index: {}]   ;;  %s779_s1 = inlined_call_operand.hbm [shape: f32[2,1,256], index: 1, kind: input, shape index: {}]   ;;  %s780_s2 = inlined_call_operand.hbm [shape: f32[2,4,256], index: 2, kind: output, shape index: {}]  }
   0x1   :  { %9 = vsyncpa [#allocation3 + $0x1], 0 }
   0x2   :  { %10 = vsyncpa [#allocation6], 0 }
   0x3   :  { %12 = vsyncpa [#allocation6 + $0x1], 0 }
   0x4   :  { %13 = vsyncpa [#allocation4], 0 }
   0x5   :  { %15 = vsyncpa [#allocation4 + $0x1], 0  ;;  %s614_s9 = smov 0   ;;  %s616_s10 = smov 0  }
   0x6   :  { %s618_s11 = smov 0   ;;  %s620_s12 = smov 0  }
   0x7   :  { %s622_s13 = smov 0   ;;  %s624_s14 = smov 0  }
   0x8 LB: > { %s365_s15 = sadd.s32 4294967295, %s594_s14   ;;  %s366_s16 = sadd.s32 4294967294, %s594_s14   ;;  %s594_s14 = sphi %s624_s14, %s21_s14   ;;  %s590_s13 = sphi %s622_s13, %s792_s13   ;;  %s586_s12 = sphi %s620_s12, %s791_s12   ;;  %s582_s11 = sphi %s618_s11, %s790_s11   ;;  %s578_s10 = sphi %s616_s10, %s789_s10   ;;  %s574_s9 = sphi %s614_s9, %s788_s9  }
   0x9   : > { %s33_s17 = sadd.s32 1, %s590_s13  ;;  %s42_s18 = sadd.s32 1, %s582_s11 }
   0xa   : > { %p35_p0 = scmp.ge.s32.totalorder %s33_s17, 2  ;;  %p49_p1 = scmp.ne.s32.totalorder %s582_s11, %s578_s10 }
   0xb   : > { %p50_p2 = scmp.eq.s32.totalorder %s594_s14, 0  ;;  %p55_p3 = scmp.ne.s32.totalorder %s578_s10, %s574_s9 }
   0xc   : > { %s794_s17 = smov (%p35_p0, %s33_s17), 0  ;;  %p56_p5 = scmp.eq.s32.totalorder %s365_s15, 0 }
   0xd   : > { %p655_p4 = por %p50_p2, %p49_p1  ;;  %s37_s20 = ssub.s32 %s590_s13, %s794_s17 }
   0xe   : > { %p109_p6 = scmp.eq.s32.totalorder %s365_s15, 1  ;;  %p40_p7 = scmp.eq.s32.totalorder %s37_s20, 0 }
   0xf   : > { %p661_p8 = por %p56_p5, %p55_p3  ;;  %p115_p10 = scmp.eq.s32.totalorder %s366_s16, 1 }
  0x10   : > { %p665_p9 = por %p109_p6, %p49_p1  ;;  %p404_p13 = scmp.lt.s32.totalorder %s594_s14, 2 }
  0x11   : > { %s670_s23 = scalar_select %p40_p7, %s582_s11, %s42_s18  }
  0x12   : > { %p672_p11 = por %p115_p10, %p55_p3  ;;  %s679_s25 = sand.u32 1, %s582_s11  }
  0x13   : > { %s369_s26 = sshll.u32 %s679_s25, 3  ;;  %s384_s27 = sshll.u32 %s590_s13, 7 }
  0x14   : > { %s147_s30 = scalar_lea.hbm %s778_s0, %s384_s27  ;;  %s139_s3 = scalar_lea.vmem [#allocation2], %s369_s26 }
  0x15   : > { %s149_s4 = sshll.u32 %s139_s3, 4  ;;  %p688_p0 = pnand %p404_p13, %p655_p4  ;;  %s150_s4 = int_to_ptr.vmem [resolvable:$true] %s149_s4 }
  0x16   : > { %p375_p1 = scmp.ge.s32.totalorder %s594_s14, 1  ;;  %p175_p2 = scmp.lt.s32.totalorder %s594_s14, 3 }
  0x17   : > { %s136_s6 = scalar_lea.sflag [#allocation3], %s679_s25  ;;  %p456_p3 = pneg %p688_p0 }
  0x18   : > { %s467_s7 = scalar_lea.vmem %s150_s4, 128  ;;  %s596_s8 = smov [#allocation2]  }
  0x19   : > { %p468_p5 = scmp.ne.s32.totalorder %s150_s4, %s467_s7  ;;  %s472_s15 = sshll.u32 %s596_s8, 4  ;;  %s473_s15 = int_to_ptr.vmem [resolvable:$false] %s472_s15 }
  0x1a   : > { %s474_s16 = scalar_lea.vmem %s473_s15, 256  ;;  %p475_p4 = scmp.lt.s32.totalorder %s150_s4, %s473_s15 }
  0x1b   : > { %p470_p6 = pnand %p468_p5, %p456_p3  ;;  %p476_p10 = scmp.lt.s32.totalorder %s474_s16, %s467_s7 }
  0x1d   : > { %p471_p7 = pneg %p470_p6  ;;  %p477_p13 = por %p476_p10, %p475_p4 }
  0x1f   : > { %p478_p12 = pnand %p477_p13, %p471_p7 }
  0x21   : > { %481 = shalt.err (!%p478_p12)
}
  0x22   : > { %396 = dma.hbm_to_vmem [thread:$0]  (!%p688_p0), %s147_s30, 128, %s150_s4, %s136_s6  }
  0x23   : > { %p706_p5 = pnand %p375_p1, %p175_p2  ;;  %s372_s19 = sshll.u32 %s679_s25, 1 }
  0x24   : > { %s385_s20 = sshll.u32 %s590_s13, 5  ;;  %s160_s29 = scalar_lea.vmem [#allocation5], %s372_s19 }
  0x25   : > { %s168_s28 = scalar_lea.hbm %s779_s1, %s385_s20  ;;  %s170_s3 = sshll.u32 %s160_s29, 4  ;;  %s171_s3 = int_to_ptr.vmem [resolvable:$true] %s170_s3 }
  0x26   : > { %s157_s7 = scalar_lea.sflag [#allocation6], %s679_s25  ;;  %s495_s8 = scalar_lea.vmem %s171_s3, 32 }
  0x27   : > { %p496_p12 = scmp.ne.s32.totalorder %s171_s3, %s495_s8  ;;  %s597_s30 = smov [#allocation5]  }
  0x28   : > { %s500_s4 = sshll.u32 %s597_s30, 4  ;;  %s501_s4 = int_to_ptr.vmem [resolvable:$false] %s500_s4 }
  0x29   : > { %p498_p6 = pnand %p496_p12, %p456_p3  ;;  %s502_s6 = scalar_lea.vmem %s501_s4, 64 }
  0x2a   : > { %p503_p1 = scmp.lt.s32.totalorder %s171_s3, %s501_s4  ;;  %p504_p2 = scmp.lt.s32.totalorder %s502_s6, %s495_s8 }
  0x2b   : > { %p499_p7 = pneg %p498_p6 }
  0x2c   : > { %p505_p4 = por %p504_p2, %p503_p1 }
  0x2e   : > { %p506_p10 = pnand %p505_p4, %p499_p7 }
  0x30   : > { %509 = shalt.err (!%p506_p10)
}
  0x31   : > { %399 = dma.hbm_to_vmem [thread:$0]  (!%p688_p0), %s168_s28, 32, %s171_s3, %s157_s7  }
  0x32   : > { %179 = sbr.rel (%p706_p5) target bundleno = 84 (0x54), region = 28  ;;  %s724_s25 = sand.u32 (!%p706_p5), 1, %s578_s10  }
  0x33   : > { %s376_s15 = sshll.u32 (!%p706_p5), %s724_s25, 3  ;;  %s182_s16 = scalar_lea.sflag (!%p706_p5), [#allocation3], %s724_s25 }
  0x34   : > { %s185_s19 = scalar_lea.vmem (!%p706_p5), [#allocation2], %s376_s15 }
  0x37   : > { %561 = dma.done.wait (%p661_p8), %s182_s16, 128  }
  0x38   : > { %563 = vsyncadd (%p661_p8), %s182_s16, 4294967168  ;;  %s377_s5 = sshll.u32 %s724_s25, 1  ;;  %s191_s18 = scalar_lea.sflag [#allocation6], %s724_s25 }
  0x39   : > { %s194_s20 = scalar_lea.vmem [#allocation5], %s377_s5 }
  0x3a   : > { %565 = dma.done.wait (%p661_p8), %s191_s18, 32  }
  0x3b   : > { %567 = vsyncadd (%p661_p8), %s191_s18, 4294967264  ;;  %v226_v0 = vlaneseq  ;;  %v223_v4 = vld [vmem:[%s194_s20] sm:$0x3]  ;;  %v224_v7 = vld [vmem:[%s185_s19] sm:$0xff]  ;;  %s219_s26 = scalar_lea.vmem [#allocation7], %s376_s15  ;;  %s386_s28 = sshll.u32 %s586_s12, 7 }
  0x3c   : > { %s255_s27 = sshll.u32 %s219_s26, 4  ;;  %s253_s3 = scalar_lea.hbm %s780_s2, %s386_s28  ;;  %s256_s27 = int_to_ptr.vmem [resolvable:$true] %s255_s27 }
  0x3d   : > { %v227_v1 = vshrl.u32 %v226_v0, 7  ;;  %s239_s7 = scalar_lea.sflag [#allocation4], %s724_s25  ;;  %s510_s8 = scalar_lea.vmem %s256_s27, 128 }
  0x3e   : > { %p511_p8 = scmp.ne.s32.totalorder %s256_s27, %s510_s8  ;;  %s598_s30 = smov [#allocation7]  }
  0x3f   : > { %v228_v2 = vsub.s32 0, %v227_v1  ;;  %v232_v3 = vsub.s32 1, %v227_v1  ;;  %s514_s4 = sshll.u32 %s598_s30, 4  ;;  %s515_s4 = int_to_ptr.vmem [resolvable:$false] %s514_s4 }
  0x40   : > { %p512_p0 = pnand %p511_p8, %p665_p9  ;;  %s516_s6 = scalar_lea.vmem %s515_s4, 256 }
  0x41   : > { %v229_v5 = vrot.slane %v223_v4, %v228_v2  ;;  %v233_v6 = vrot.slane %v223_v4, %v232_v3  ;;  %p517_p13 = scmp.lt.s32.totalorder %s256_s27, %s515_s4  ;;  %p518_p5 = scmp.lt.s32.totalorder %s516_s6, %s510_s8 }
  0x42   : > { %p513_p3 = pneg %p512_p0 }
  0x43   : > { %v234_v8 = vcombine.low %v229_v5, %v233_v6  ;;  %p519_p12 = por %p518_p5, %p517_p13 }
  0x45   : > { %v236_v9 = vadd.f32 %v234_v8, %v224_v7  ;;  %p520_p6 = pnand %p519_p12, %p513_p3 }
  0x47   : > { %237 = vst [vmem:[%s219_s26] sm:$0xff] %v236_v9 }
  0x48   : > { %523 = shalt.err (!%p520_p6)
}
  0x49   : > { %s524_s12 = scalar_lea.hbm %s253_s3, 128  ;;  %s528_s16 = scalar_lea.hbm %s780_s2, 256 }
  0x4a   : > { %p525_p7 = scmp.ne.s32.totalorder %s253_s3, %s524_s12  ;;  %p529_p4 = scmp.lt.s32.totalorder %s253_s3, %s780_s2 }
  0x4b   : > { %p530_p10 = scmp.lt.s32.totalorder %s528_s16, %s524_s12 }
  0x4c   : > { %p526_p1 = pnand %p525_p7, %p665_p9 }
  0x4d   : > { %p531_p8 = por %p530_p10, %p529_p4 }
  0x4e   : > { %p527_p2 = pneg %p526_p1 }
  0x50   : > { %p532_p0 = pnand %p531_p8, %p527_p2 }
  0x52   : > { %535 = shalt.err (!%p532_p0)
}
  0x53   : > { %391 = dma.vmem_to_hbm [thread:$0]  (%p665_p9), %s256_s27, 128, %s253_s3, %s239_s7  }
  0x54 PF: > { %s267_s18 = sand.u32 1, %s574_s9   ;;  %p787_p3 = scmp.ge.s32.totalorder %s594_s14, 2 }
  0x55   : > { %s268_s20 = scalar_lea.sflag [#allocation4], %s267_s18 }
  0x56   : > { %p401_p13 = pnand %p787_p3, %p672_p11 }
  0x58   : > { %p402_p5 = pneg %p401_p13 }
  0x5a   : > { %569 = dma.done.wait (%p402_p5), %s268_s20, 128  }
  0x5b   : > { %571 = vsyncadd (%p402_p5), %s268_s20, 4294967168  ;;  %s21_s14 = sadd.s32 1, %s594_s14   ;;  %s788_s9 = smov %s578_s10 }
  0x5c   : > { %p18_p12 = scmp.ge.s32.totalorder %s21_s14, 4   ;;  %s789_s10 = smov %s582_s11 }
  0x5d   : > { %s790_s11 = smov %s670_s23  ;;  %s791_s12 = smov %s590_s13 }
  0x5e   : > { %s792_s13 = smov %s794_s17  ;;  %20 = sbr.rel (!%p18_p12) target bundleno = 8 (0x8), region = 86 }
  0x63   :  { %273 = vsyncpa [#allocation3], 1 }
  0x64   :  { %275 = vsyncpa [#allocation3 + $0x1], 1 }
  0x65   :  { %276 = vsyncpa [#allocation6], 1 }
  0x66   :  { %278 = vsyncpa [#allocation6 + $0x1], 1 }
  0x67   :  { %279 = vsyncpa [#allocation4], 1 }
  0x68   :  { %281 = vsyncpa [#allocation4 + $0x1], 1 }

</bundles_post_ra>
